<compile_context>
chip_gen: v6e
topology: v6e:2x2x1
jax: 0.10.0
libtpu: 0.0.40
codegen_flags: <defaults>
</compile_context>

<pallas_src>
import jax
import jax.numpy as jnp
from jax.experimental import pallas as pl
from jax.experimental.pallas import tpu as pltpu


def _add_kernel(a_ref, b_ref, o_ref):
    # Whole-array elementwise add on the VPU. Last two dims (7, 768):
    # lane dim 768 = 6*128 -> unmasked vst; 7 rows -> one masked sublane group (noise).
    o_ref[...] = a_ref[...] + b_ref[...]


@jax.jit
def pallas_add(x295, x302):
    assert x295.shape == x302.shape
    assert x295.dtype == x302.dtype
    n = x295.size
    itemsize = jnp.dtype(x295.dtype).itemsize
    return pl.pallas_call(
        _add_kernel,
        out_shape=jax.ShapeDtypeStruct(x295.shape, x295.dtype),
        # Gridless: whole arrays resident in VMEM, no pipeline prologue/epilogue.
        in_specs=[
            pl.BlockSpec(memory_space=pltpu.MemorySpace.VMEM),
            pl.BlockSpec(memory_space=pltpu.MemorySpace.VMEM),
        ],
        out_specs=pl.BlockSpec(memory_space=pltpu.MemorySpace.VMEM),
        # Advisory cost so XLA can overlap this tiny op with its neighbors under jit.
        cost_estimate=pl.CostEstimate(
            flops=n,
            transcendentals=0,
            bytes_accessed=3 * n * itemsize,
        ),
    )(x295, x302)


if __name__ == "__main__":
    key = jax.random.PRNGKey(0)
    k1, k2 = jax.random.split(key)
    x295 = jax.random.normal(k1, (1, 7, 7, 768), dtype=jnp.float32)
    x302 = jax.random.normal(k2, (1, 7, 7, 768), dtype=jnp.float32)

    ref = x295 + x302

    result = pallas_add(x295, x302)
    jax.block_until_ready(result)

    assert result.shape == (1, 7, 7, 768)
    assert result.dtype == jnp.float32
    assert jnp.allclose(result, ref, atol=1e-6, rtol=1e-6)

    print("KERNEL_OK")
</pallas_src>

<mosaic_0001>
module attributes {stable_mosaic.version = 11 : i64} {
  func.func @_add_kernel(%arg0: memref<1x7x7x768xf32, #tpu.memory_space<vmem>>, %arg1: memref<1x7x7x768xf32, #tpu.memory_space<vmem>>, %arg2: memref<1x7x7x768xf32, #tpu.memory_space<vmem>>) attributes {dimension_semantics = [], scalar_prefetch = 0 : i64, scratch_operands = 0 : i64, tpu.core_type = #tpu.core_type<tc>} {
    %c0 = arith.constant 0 : index
    %c0_0 = arith.constant 0 : index
    %c0_1 = arith.constant 0 : index
    %c0_2 = arith.constant 0 : index
    %0 = vector.load %arg0[%c0, %c0_0, %c0_1, %c0_2] : memref<1x7x7x768xf32, #tpu.memory_space<vmem>>, vector<1x7x7x768xf32>
    %c0_3 = arith.constant 0 : index
    %c0_4 = arith.constant 0 : index
    %c0_5 = arith.constant 0 : index
    %c0_6 = arith.constant 0 : index
    %1 = vector.load %arg1[%c0_3, %c0_4, %c0_5, %c0_6] : memref<1x7x7x768xf32, #tpu.memory_space<vmem>>, vector<1x7x7x768xf32>
    %2 = arith.addf %0, %1 : vector<1x7x7x768xf32>
    %c0_7 = arith.constant 0 : index
    %c0_8 = arith.constant 0 : index
    %c0_9 = arith.constant 0 : index
    %c0_10 = arith.constant 0 : index
    %3 = vector.load %arg2[%c0_7, %c0_8, %c0_9, %c0_10] : memref<1x7x7x768xf32, #tpu.memory_space<vmem>>, vector<1x7x7x768xf32>
    tpu.vector_store %arg2[%c0_7, %c0_8, %c0_9, %c0_10], %2 {strides = array<i32>} : memref<1x7x7x768xf32, #tpu.memory_space<vmem>>, vector<1x7x7x768xf32>,
    return
  }
}

</mosaic_0001>

<bundles_post_ra>
// kernel: pallas_add.1
= control target key start
LH: loop header
LB: loop body
LE: loop exit
PB: predicated region body
PF: predicated region fallthrough
CT: control target
= control target key end

     0   :  { %s576_s0 = inlined_call_operand.vmem [shape: f32[1,7,7,768], index: 0, kind: input, shape index: {}]   ;;  %s577_s1 = inlined_call_operand.vmem [shape: f32[1,7,7,768], index: 1, kind: input, shape index: {}]   ;;  %s578_s2 = inlined_call_operand.vmem [shape: f32[1,7,7,768], index: 2, kind: output, shape index: {}]  }
   0x1   :  { %v11_v0 = vld [vmem:[%s576_s0] sm:$0x7f]  ;;  %v12_v2 = vld [vmem:[%s576_s0 + $0x8] sm:$0x7f]  ;;  %v13_v5 = vld [vmem:[%s576_s0 + $0x10] sm:$0x7f] }
   0x2   :  { %v53_v1 = vld [vmem:[%s577_s1] sm:$0x7f]  ;;  %v54_v4 = vld [vmem:[%s577_s1 + $0x8] sm:$0x7f]  ;;  %v55_v6 = vld [vmem:[%s577_s1 + $0x10] sm:$0x7f] }
   0x3   :  { %v95_v3 = vadd.f32 %v53_v1, %v11_v0  ;;  %v96_v7 = vadd.f32 %v54_v4, %v12_v2  ;;  %v97_v8 = vadd.f32 %v55_v6, %v13_v5  ;;  %v14_v9 = vld [vmem:[%s576_s0 + $0x18] sm:$0x7f]  ;;  %v15_v11 = vld [vmem:[%s576_s0 + $0x20] sm:$0x7f]  ;;  %v16_v14 = vld [vmem:[%s576_s0 + $0x28] sm:$0x7f] }
   0x4   :  { %v56_v10 = vld [vmem:[%s577_s1 + $0x18] sm:$0x7f]  ;;  %v57_v13 = vld [vmem:[%s577_s1 + $0x20] sm:$0x7f]  ;;  %v58_v15 = vld [vmem:[%s577_s1 + $0x28] sm:$0x7f] }
   0x5   :  { %137 = vst [vmem:[%s578_s2] sm:$0x7f] %v95_v3  ;;  %v98_v12 = vadd.f32 %v56_v10, %v14_v9  ;;  %138 = vst [vmem:[%s578_s2 + $0x8] sm:$0x7f] %v96_v7  ;;  %v99_v16 = vadd.f32 %v57_v13, %v15_v11  ;;  %v100_v17 = vadd.f32 %v58_v15, %v16_v14  ;;  %v17_v18 = vld [vmem:[%s576_s0 + $0x30] sm:$0x7f] }
   0x6   :  { %139 = vst [vmem:[%s578_s2 + $0x10] sm:$0x7f] %v97_v8  ;;  %v59_v19 = vld [vmem:[%s577_s1 + $0x30] sm:$0x7f]  ;;  %v18_v20 = vld [vmem:[%s576_s0 + $0x38] sm:$0x7f] }
   0x7   :  { %140 = vst [vmem:[%s578_s2 + $0x18] sm:$0x7f] %v98_v12  ;;  %v101_v21 = vadd.f32 %v59_v19, %v17_v18  ;;  %v60_v22 = vld [vmem:[%s577_s1 + $0x38] sm:$0x7f]  ;;  %v19_v23 = vld [vmem:[%s576_s0 + $0x40] sm:$0x7f] }
   0x8   :  { %v61_v24 = vld [vmem:[%s577_s1 + $0x40] sm:$0x7f]  ;;  %141 = vst [vmem:[%s578_s2 + $0x20] sm:$0x7f] %v99_v16  ;;  %142 = vst [vmem:[%s578_s2 + $0x28] sm:$0x7f] %v100_v17  ;;  %v102_v25 = vadd.f32 %v60_v22, %v18_v20 }
   0x9   :  { %v103_v26 = vadd.f32 %v61_v24, %v19_v23  ;;  %v20_v27 = vld [vmem:[%s576_s0 + $0x48] sm:$0x7f]  ;;  %v21_v29 = vld [vmem:[%s576_s0 + $0x50] sm:$0x7f]  ;;  %143 = vst [vmem:[%s578_s2 + $0x30] sm:$0x7f] %v101_v21 }
   0xa   :  { %v62_v28 = vld [vmem:[%s577_s1 + $0x48] sm:$0x7f]  ;;  %v63_v31 = vld [vmem:[%s577_s1 + $0x50] sm:$0x7f]  ;;  %v22_v32 = vld [vmem:[%s576_s0 + $0x58] sm:$0x7f] }
   0xb   :  { %v104_v30 = vadd.f32 %v62_v28, %v20_v27  ;;  %v64_v33 = vld [vmem:[%s577_s1 + $0x58] sm:$0x7f]  ;;  %144 = vst [vmem:[%s578_s2 + $0x38] sm:$0x7f] %v102_v25  ;;  %145 = vst [vmem:[%s578_s2 + $0x40] sm:$0x7f] %v103_v26  ;;  %v105_v34 = vadd.f32 %v63_v31, %v21_v29 }
   0xc   :  { %v106_v35 = vadd.f32 %v64_v33, %v22_v32  ;;  %v23_v36 = vld [vmem:[%s576_s0 + $0x60] sm:$0x7f]  ;;  %v24_v38 = vld [vmem:[%s576_s0 + $0x68] sm:$0x7f]  ;;  %v25_v41 = vld [vmem:[%s576_s0 + $0x70] sm:$0x7f] }
   0xd   :  { %v65_v37 = vld [vmem:[%s577_s1 + $0x60] sm:$0x7f]  ;;  %146 = vst [vmem:[%s578_s2 + $0x48] sm:$0x7f] %v104_v30  ;;  %v66_v40 = vld [vmem:[%s577_s1 + $0x68] sm:$0x7f] }
   0xe   :  { %v107_v39 = vadd.f32 %v65_v37, %v23_v36  ;;  %v67_v42 = vld [vmem:[%s577_s1 + $0x70] sm:$0x7f]  ;;  %147 = vst [vmem:[%s578_s2 + $0x50] sm:$0x7f] %v105_v34  ;;  %148 = vst [vmem:[%s578_s2 + $0x58] sm:$0x7f] %v106_v35  ;;  %v108_v43 = vadd.f32 %v66_v40, %v24_v38 }
   0xf   :  { %v109_v44 = vadd.f32 %v67_v42, %v25_v41  ;;  %v26_v45 = vld [vmem:[%s576_s0 + $0x78] sm:$0x7f]  ;;  %v27_v47 = vld [vmem:[%s576_s0 + $0x80] sm:$0x7f]  ;;  %v28_v50 = vld [vmem:[%s576_s0 + $0x88] sm:$0x7f] }
  0x10   :  { %v68_v46 = vld [vmem:[%s577_s1 + $0x78] sm:$0x7f]  ;;  %149 = vst [vmem:[%s578_s2 + $0x60] sm:$0x7f] %v107_v39  ;;  %v69_v49 = vld [vmem:[%s577_s1 + $0x80] sm:$0x7f] }
  0x11   :  { %v110_v48 = vadd.f32 %v68_v46, %v26_v45  ;;  %v70_v51 = vld [vmem:[%s577_s1 + $0x88] sm:$0x7f]  ;;  %150 = vst [vmem:[%s578_s2 + $0x68] sm:$0x7f] %v108_v43  ;;  %151 = vst [vmem:[%s578_s2 + $0x70] sm:$0x7f] %v109_v44  ;;  %v111_v52 = vadd.f32 %v69_v49, %v27_v47 }
  0x12   :  { %v112_v53 = vadd.f32 %v70_v51, %v28_v50  ;;  %v29_v54 = vld [vmem:[%s576_s0 + $0x90] sm:$0x7f]  ;;  %v30_v56 = vld [vmem:[%s576_s0 + $0x98] sm:$0x7f]  ;;  %v31_v59 = vld [vmem:[%s576_s0 + $0xa0] sm:$0x7f] }
  0x13   :  { %v71_v55 = vld [vmem:[%s577_s1 + $0x90] sm:$0x7f]  ;;  %152 = vst [vmem:[%s578_s2 + $0x78] sm:$0x7f] %v110_v48  ;;  %v72_v58 = vld [vmem:[%s577_s1 + $0x98] sm:$0x7f] }
  0x14   :  { %v113_v57 = vadd.f32 %v71_v55, %v29_v54  ;;  %v73_v60 = vld [vmem:[%s577_s1 + $0xa0] sm:$0x7f]  ;;  %153 = vst [vmem:[%s578_s2 + $0x80] sm:$0x7f] %v111_v52  ;;  %154 = vst [vmem:[%s578_s2 + $0x88] sm:$0x7f] %v112_v53  ;;  %v114_v61 = vadd.f32 %v72_v58, %v30_v56 }
  0x15   :  { %v115_v62 = vadd.f32 %v73_v60, %v31_v59  ;;  %v32_v63 = vld [vmem:[%s576_s0 + $0xa8] sm:$0x7f]  ;;  %v33_v1 = vld [vmem:[%s576_s0 + $0xb0] sm:$0x7f]  ;;  %v34_v4 = vld [vmem:[%s576_s0 + $0xb8] sm:$0x7f] }
  0x16   :  { %v74_v0 = vld [vmem:[%s577_s1 + $0xa8] sm:$0x7f]  ;;  %155 = vst [vmem:[%s578_s2 + $0x90] sm:$0x7f] %v113_v57  ;;  %v75_v3 = vld [vmem:[%s577_s1 + $0xb0] sm:$0x7f] }
  0x17   :  { %v116_v2 = vadd.f32 %v74_v0, %v32_v63  ;;  %v76_v5 = vld [vmem:[%s577_s1 + $0xb8] sm:$0x7f]  ;;  %156 = vst [vmem:[%s578_s2 + $0x98] sm:$0x7f] %v114_v61  ;;  %157 = vst [vmem:[%s578_s2 + $0xa0] sm:$0x7f] %v115_v62  ;;  %v117_v6 = vadd.f32 %v75_v3, %v33_v1 }
  0x18   :  { %v118_v7 = vadd.f32 %v76_v5, %v34_v4  ;;  %v35_v8 = vld [vmem:[%s576_s0 + $0xc0] sm:$0x7f]  ;;  %v36_v10 = vld [vmem:[%s576_s0 + $0xc8] sm:$0x7f]  ;;  %v37_v13 = vld [vmem:[%s576_s0 + $0xd0] sm:$0x7f] }
  0x19   :  { %v77_v9 = vld [vmem:[%s577_s1 + $0xc0] sm:$0x7f]  ;;  %158 = vst [vmem:[%s578_s2 + $0xa8] sm:$0x7f] %v116_v2  ;;  %v78_v12 = vld [vmem:[%s577_s1 + $0xc8] sm:$0x7f] }
  0x1a   :  { %v119_v11 = vadd.f32 %v77_v9, %v35_v8  ;;  %v79_v14 = vld [vmem:[%s577_s1 + $0xd0] sm:$0x7f]  ;;  %159 = vst [vmem:[%s578_s2 + $0xb0] sm:$0x7f] %v117_v6  ;;  %160 = vst [vmem:[%s578_s2 + $0xb8] sm:$0x7f] %v118_v7  ;;  %v120_v15 = vadd.f32 %v78_v12, %v36_v10 }
  0x1b   :  { %v121_v16 = vadd.f32 %v79_v14, %v37_v13  ;;  %v38_v17 = vld [vmem:[%s576_s0 + $0xd8] sm:$0x7f]  ;;  %v39_v19 = vld [vmem:[%s576_s0 + $0xe0] sm:$0x7f]  ;;  %v40_v22 = vld [vmem:[%s576_s0 + $0xe8] sm:$0x7f] }
  0x1c   :  { %v80_v18 = vld [vmem:[%s577_s1 + $0xd8] sm:$0x7f]  ;;  %161 = vst [vmem:[%s578_s2 + $0xc0] sm:$0x7f] %v119_v11  ;;  %v81_v21 = vld [vmem:[%s577_s1 + $0xe0] sm:$0x7f] }
  0x1d   :  { %v122_v20 = vadd.f32 %v80_v18, %v38_v17  ;;  %v82_v23 = vld [vmem:[%s577_s1 + $0xe8] sm:$0x7f]  ;;  %162 = vst [vmem:[%s578_s2 + $0xc8] sm:$0x7f] %v120_v15  ;;  %163 = vst [vmem:[%s578_s2 + $0xd0] sm:$0x7f] %v121_v16  ;;  %v123_v24 = vadd.f32 %v81_v21, %v39_v19 }
  0x1e   :  { %v124_v25 = vadd.f32 %v82_v23, %v40_v22  ;;  %v41_v26 = vld [vmem:[%s576_s0 + $0xf0] sm:$0x7f]  ;;  %v42_v28 = vld [vmem:[%s576_s0 + $0xf8] sm:$0x7f]  ;;  %v43_v31 = vld [vmem:[%s576_s0 + $0x100] sm:$0x7f] }
  0x1f   :  { %v83_v27 = vld [vmem:[%s577_s1 + $0xf0] sm:$0x7f]  ;;  %164 = vst [vmem:[%s578_s2 + $0xd8] sm:$0x7f] %v122_v20  ;;  %v84_v30 = vld [vmem:[%s577_s1 + $0xf8] sm:$0x7f] }
  0x20   :  { %v125_v29 = vadd.f32 %v83_v27, %v41_v26  ;;  %v85_v32 = vld [vmem:[%s577_s1 + $0x100] sm:$0x7f]  ;;  %165 = vst [vmem:[%s578_s2 + $0xe0] sm:$0x7f] %v123_v24  ;;  %166 = vst [vmem:[%s578_s2 + $0xe8] sm:$0x7f] %v124_v25  ;;  %v126_v33 = vadd.f32 %v84_v30, %v42_v28 }
  0x21   :  { %v127_v34 = vadd.f32 %v85_v32, %v43_v31  ;;  %v44_v35 = vld [vmem:[%s576_s0 + $0x108] sm:$0x7f]  ;;  %v45_v37 = vld [vmem:[%s576_s0 + $0x110] sm:$0x7f]  ;;  %v46_v40 = vld [vmem:[%s576_s0 + $0x118] sm:$0x7f] }
  0x22   :  { %v86_v36 = vld [vmem:[%s577_s1 + $0x108] sm:$0x7f]  ;;  %167 = vst [vmem:[%s578_s2 + $0xf0] sm:$0x7f] %v125_v29  ;;  %v87_v39 = vld [vmem:[%s577_s1 + $0x110] sm:$0x7f] }
  0x23   :  { %v128_v38 = vadd.f32 %v86_v36, %v44_v35  ;;  %v88_v41 = vld [vmem:[%s577_s1 + $0x118] sm:$0x7f]  ;;  %168 = vst [vmem:[%s578_s2 + $0xf8] sm:$0x7f] %v126_v33  ;;  %169 = vst [vmem:[%s578_s2 + $0x100] sm:$0x7f] %v127_v34  ;;  %v129_v42 = vadd.f32 %v87_v39, %v45_v37 }
  0x24   :  { %v130_v43 = vadd.f32 %v88_v41, %v46_v40  ;;  %v47_v44 = vld [vmem:[%s576_s0 + $0x120] sm:$0x7f]  ;;  %v48_v46 = vld [vmem:[%s576_s0 + $0x128] sm:$0x7f]  ;;  %v49_v49 = vld [vmem:[%s576_s0 + $0x130] sm:$0x7f] }
  0x25   :  { %v89_v45 = vld [vmem:[%s577_s1 + $0x120] sm:$0x7f]  ;;  %170 = vst [vmem:[%s578_s2 + $0x108] sm:$0x7f] %v128_v38  ;;  %v90_v48 = vld [vmem:[%s577_s1 + $0x128] sm:$0x7f] }
  0x26   :  { %v131_v47 = vadd.f32 %v89_v45, %v47_v44  ;;  %v91_v50 = vld [vmem:[%s577_s1 + $0x130] sm:$0x7f]  ;;  %171 = vst [vmem:[%s578_s2 + $0x110] sm:$0x7f] %v129_v42  ;;  %172 = vst [vmem:[%s578_s2 + $0x118] sm:$0x7f] %v130_v43  ;;  %v132_v51 = vadd.f32 %v90_v48, %v48_v46 }
  0x27   :  { %v133_v52 = vadd.f32 %v91_v50, %v49_v49  ;;  %v50_v53 = vld [vmem:[%s576_s0 + $0x138] sm:$0x7f]  ;;  %v51_v55 = vld [vmem:[%s576_s0 + $0x140] sm:$0x7f]  ;;  %v52_v58 = vld [vmem:[%s576_s0 + $0x148] sm:$0x7f] }
  0x28   :  { %v92_v54 = vld [vmem:[%s577_s1 + $0x138] sm:$0x7f]  ;;  %173 = vst [vmem:[%s578_s2 + $0x120] sm:$0x7f] %v131_v47  ;;  %v93_v57 = vld [vmem:[%s577_s1 + $0x140] sm:$0x7f] }
  0x29   :  { %v134_v56 = vadd.f32 %v92_v54, %v50_v53  ;;  %v94_v59 = vld [vmem:[%s577_s1 + $0x148] sm:$0x7f]  ;;  %174 = vst [vmem:[%s578_s2 + $0x128] sm:$0x7f] %v132_v51  ;;  %175 = vst [vmem:[%s578_s2 + $0x130] sm:$0x7f] %v133_v52  ;;  %v135_v60 = vadd.f32 %v93_v57, %v51_v55 }
  0x2a   :  { %v136_v61 = vadd.f32 %v94_v59, %v52_v58 }
  0x2b   :  { %176 = vst [vmem:[%s578_s2 + $0x138] sm:$0x7f] %v134_v56  ;;  %177 = vst [vmem:[%s578_s2 + $0x140] sm:$0x7f] %v135_v60 }
  0x2c   :  { %178 = vst [vmem:[%s578_s2 + $0x148] sm:$0x7f] %v136_v61 }

</bundles_post_ra>
